<compile_context>
chip_gen: v6e
topology: v6e:2x2x1
jax: 0.10.0
libtpu: 0.0.40
codegen_flags: <defaults>
</compile_context>

<pallas_src>
import math

import jax
import jax.numpy as jnp
from jax import lax
from jax.experimental import pallas as pl
from jax.experimental.pallas import tpu as pltpu

NORMALIZED_SHAPE = (2, 2, 3)
D = NORMALIZED_SHAPE[0] * NORMALIZED_SHAPE[1] * NORMALIZED_SHAPE[2]  # 12
EPS = 0.5


def _layer_norm_kernel(x_ref, w_ref, b_ref, p_ref, e_ref,
                       out_ref, mean_ref, rstd_ref):
    # x_ref:   (rt, G*D)   lane-dense slab: G groups of D elements per row.
    # w_ref/b_ref: (1, G*D) weight/bias tiled across the G groups (resident).
    # p_ref:   (G*D, G)    0/1 matrix: column g sums group g   (MXU reduce).
    # e_ref:   (G, G*D)    0/1 matrix: row g broadcasts group g (MXU bcast).
    # out_ref: (rt, G*D);  mean_ref/rstd_ref: (rt, G).
    x = x_ref[...]
    p = p_ref[...]
    e = e_ref[...]
    inv_d = jnp.float32(1.0 / D)

    # Per-group mean via MXU segment-sum, broadcast back via MXU.
    mean = jnp.dot(x, p, preferred_element_type=jnp.float32) * inv_d      # (rt, G)
    mean_b = jnp.dot(mean, e, preferred_element_type=jnp.float32)         # (rt, G*D)

    # Two-pass variance: var = mean((x - mean)^2)  (no cancellation issues).
    xc = x - mean_b
    var = jnp.dot(xc * xc, p, preferred_element_type=jnp.float32) * inv_d  # (rt, G)
    rstd = lax.rsqrt(var + EPS)                                            # EUP
    rstd_b = jnp.dot(rstd, e, preferred_element_type=jnp.float32)          # (rt, G*D)

    out_ref[...] = xc * rstd_b * w_ref[...] + b_ref[...]
    mean_ref[...] = mean
    rstd_ref[...] = rstd


def _pick_group_pack(r):
    """Largest G <= 32 dividing r (G=32 -> lane width 384, fully lane-dense)."""
    for g in range(min(32, r), 0, -1):
        if r % g == 0:
            return g
    return 1


def native_layer_norm(x, weight, bias, *, row_tile=2048):
    """Pallas implementation of aten.native_layer_norm(x, [2,2,3], w, b, eps=0.5)."""
    assert x.shape[-3:] == NORMALIZED_SHAPE
    assert weight.shape == NORMALIZED_SHAPE and bias.shape == NORMALIZED_SHAPE

    lead_shape = x.shape[:-3]
    R = math.prod(lead_shape) if lead_shape else 1

    G = _pick_group_pack(R)       # groups packed per row (32 when R % 32 == 0)
    L = G * D                     # lane width of the working view
    Rg = R // G                   # rows of the working view

    # Free (contiguous, row-major) reshapes: no wrapper copy passes.
    x2 = x.reshape(Rg, L)
    w_t = jnp.tile(weight.reshape(1, D), (1, G))    # (1, L), tiny
    b_t = jnp.tile(bias.reshape(1, D), (1, G))      # (1, L), tiny

    # Segment-sum / segment-broadcast matrices (tiny, resident in VMEM).
    group_of_lane = jnp.arange(L, dtype=jnp.int32) // D
    P = (group_of_lane[:, None] == jnp.arange(G, dtype=jnp.int32)[None, :]
         ).astype(jnp.float32)                      # (L, G)
    E = P.T                                         # (G, L)

    # Row tiling: ragged last block is handled by Pallas (OOB writes masked).
    if Rg <= row_tile:
        rt = Rg
        grid_n = 1
    else:
        rt = max(8, (row_tile // 8) * 8)
        grid_n = pl.cdiv(Rg, rt)

    cost = pl.CostEstimate(
        flops=int(Rg) * (8 * L * G + 6 * L),
        transcendentals=int(R),
        bytes_accessed=int(R) * (2 * D * 4 + 8),
    )

    out2, mean2, rstd2 = pl.pallas_call(
        _layer_norm_kernel,
        grid=(grid_n,),
        in_specs=[
            pl.BlockSpec((rt, L), lambda i: (i, 0)),
            pl.BlockSpec((1, L), lambda i: (0, 0)),   # weight: resident
            pl.BlockSpec((1, L), lambda i: (0, 0)),   # bias:   resident
            pl.BlockSpec((L, G), lambda i: (0, 0)),   # P:      resident
            pl.BlockSpec((G, L), lambda i: (0, 0)),   # E:      resident
        ],
        out_specs=(
            pl.BlockSpec((rt, L), lambda i: (i, 0)),
            pl.BlockSpec((rt, G), lambda i: (i, 0)),
            pl.BlockSpec((rt, G), lambda i: (i, 0)),
        ),
        out_shape=(
            jax.ShapeDtypeStruct((Rg, L), x.dtype),
            jax.ShapeDtypeStruct((Rg, G), jnp.float32),
            jax.ShapeDtypeStruct((Rg, G), jnp.float32),
        ),
        compiler_params=pltpu.CompilerParams(
            dimension_semantics=("parallel",),        # v7x: 2-TC sharding of row axis
            vmem_limit_bytes=32 * 1024 * 1024,
        ),
        cost_estimate=cost,
    )(x2, w_t, b_t, P, E)

    # Free reshapes back to the module's output shapes.
    out = out2.reshape(x.shape)
    stat_shape = lead_shape + (1, 1, 1)
    mean = mean2.reshape(stat_shape)
    rstd = rstd2.reshape(stat_shape)
    return out, mean, rstd


if __name__ == "__main__":
    key = jax.random.PRNGKey(0)
    kx, kw, kb, kx2, kx3 = jax.random.split(key, 5)

    weight = jax.random.normal(kw, NORMALIZED_SHAPE, dtype=jnp.float32)
    bias = jax.random.normal(kb, NORMALIZED_SHAPE, dtype=jnp.float32)

    def reference(xv):
        lead = xv.shape[:-3]
        r = math.prod(lead) if lead else 1
        xr = xv.reshape(r, D)
        m = jnp.mean(xr, axis=-1, keepdims=True)
        v = jnp.mean((xr - m) ** 2, axis=-1, keepdims=True)
        rs = 1.0 / jnp.sqrt(v + EPS)
        o = ((xr - m) * rs).reshape(xv.shape) * weight + bias
        stat_shape = lead + (1, 1, 1)
        return o, m.reshape(stat_shape), rs.reshape(stat_shape)

    def check(xv, **kw):
        out, mean, rstd = native_layer_norm(xv, weight, bias, **kw)
        jax.block_until_ready((out, mean, rstd))
        o_r, m_r, r_r = reference(xv)
        assert jnp.allclose(out, o_r, atol=1e-5, rtol=1e-5)
        assert jnp.allclose(mean, m_r, atol=1e-5, rtol=1e-5)
        assert jnp.allclose(rstd, r_r, atol=1e-5, rtol=1e-5)

    # 1) Small rank-5 input, R = 4*16 = 64 (divisible by 32 -> lane-dense G=32 path).
    x = jax.random.normal(kx, (4, 16, 2, 2, 3), dtype=jnp.float32)
    check(x)

    # 2) Multi-step grid with a ragged last block (no padding anywhere):
    #    R = 8*36 = 288 -> Rg = 9 rows of 32 groups; row_tile=8 -> grid of 2.
    x2 = jax.random.normal(kx2, (8, 36, 2, 2, 3), dtype=jnp.float32)
    check(x2, row_tile=8)

    # 3) R not divisible by 32 -> fallback group packing (R = 15 -> G = 15).
    x3 = jax.random.normal(kx3, (3, 5, 2, 2, 3), dtype=jnp.float32)
    check(x3)

    print("KERNEL_OK")
</pallas_src>

<mosaic_0001>
module attributes {stable_mosaic.version = 11 : i64} {
  func.func @_layer_norm_kernel(%arg0: i32, %arg1: memref<2x384xf32, #tpu.memory_space<vmem>>, %arg2: memref<1x384xf32, #tpu.memory_space<vmem>>, %arg3: memref<1x384xf32, #tpu.memory_space<vmem>>, %arg4: memref<384x32xf32, #tpu.memory_space<vmem>>, %arg5: memref<32x384xf32, #tpu.memory_space<vmem>>, %arg6: memref<2x384xf32, #tpu.memory_space<vmem>>, %arg7: memref<2x32xf32, #tpu.memory_space<vmem>>, %arg8: memref<2x32xf32, #tpu.memory_space<vmem>>) attributes {dimension_semantics = [#tpu.dimension_semantics<parallel>], iteration_bounds = array<i64: 1>, scalar_prefetch = 0 : i64, scratch_operands = 0 : i64, tpu.core_type = #tpu.core_type<tc>, window_params = [{transform_indices = @transform_0, window_bounds = array<i64: 2, 384>}, {pipeline_mode = #tpu.pipeline_mode<synchronous>, transform_indices = @transform_1, window_bounds = array<i64: 1, 384>}, {pipeline_mode = #tpu.pipeline_mode<synchronous>, transform_indices = @transform_2, window_bounds = array<i64: 1, 384>}, {pipeline_mode = #tpu.pipeline_mode<synchronous>, transform_indices = @transform_3, window_bounds = array<i64: 384, 32>}, {pipeline_mode = #tpu.pipeline_mode<synchronous>, transform_indices = @transform_4, window_bounds = array<i64: 32, 384>}, {transform_indices = @transform_5, window_bounds = array<i64: 2, 384>}, {transform_indices = @transform_6, window_bounds = array<i64: 2, 32>}, {transform_indices = @transform_7, window_bounds = array<i64: 2, 32>}]} {
    %c0 = arith.constant 0 : index
    %c0_0 = arith.constant 0 : index
    %0 = vector.load %arg1[%c0, %c0_0] : memref<2x384xf32, #tpu.memory_space<vmem>>, vector<2x384xf32>
    %c0_1 = arith.constant 0 : index
    %c0_2 = arith.constant 0 : index
    %1 = vector.load %arg4[%c0_1, %c0_2] : memref<384x32xf32, #tpu.memory_space<vmem>>, vector<384x32xf32>
    %c0_3 = arith.constant 0 : index
    %c0_4 = arith.constant 0 : index
    %2 = vector.load %arg5[%c0_3, %c0_4] : memref<32x384xf32, #tpu.memory_space<vmem>>, vector<32x384xf32>
    %cst = arith.constant dense<0.000000e+00> : vector<2x32xf32>
    %3 = tpu.matmul %0, %1, %cst {dimension_numbers = #tpu.dot_dimension_numbers<[1], [0], [0], [1], [0, 0, 1, 1], [], []>} : vector<2x384xf32>, vector<384x32xf32>, vector<2x32xf32> -> vector<2x32xf32>
    %cst_5 = arith.constant 0.0833333358 : f32
    %4 = vector.broadcast %cst_5 : f32 to vector<2x32xf32>
    %5 = arith.mulf %3, %4 : vector<2x32xf32>
    %cst_6 = arith.constant dense<0.000000e+00> : vector<2x384xf32>
    %6 = tpu.matmul %5, %2, %cst_6 {dimension_numbers = #tpu.dot_dimension_numbers<[1], [0], [0], [1], [0, 0, 1, 1], [], []>} : vector<2x32xf32>, vector<32x384xf32>, vector<2x384xf32> -> vector<2x384xf32>
    %7 = arith.subf %0, %6 : vector<2x384xf32>
    %8 = arith.mulf %7, %7 : vector<2x384xf32>
    %cst_7 = arith.constant dense<0.000000e+00> : vector<2x32xf32>
    %9 = tpu.matmul %8, %1, %cst_7 {dimension_numbers = #tpu.dot_dimension_numbers<[1], [0], [0], [1], [0, 0, 1, 1], [], []>} : vector<2x384xf32>, vector<384x32xf32>, vector<2x32xf32> -> vector<2x32xf32>
    %cst_8 = arith.constant 0.0833333358 : f32
    %10 = vector.broadcast %cst_8 : f32 to vector<2x32xf32>
    %11 = arith.mulf %9, %10 : vector<2x32xf32>
    %cst_9 = arith.constant 5.000000e-01 : f32
    %12 = vector.broadcast %cst_9 : f32 to vector<2x32xf32>
    %13 = arith.addf %11, %12 : vector<2x32xf32>
    %14 = math.rsqrt %13 : vector<2x32xf32>
    %cst_10 = arith.constant dense<0.000000e+00> : vector<2x384xf32>
    %15 = tpu.matmul %14, %2, %cst_10 {dimension_numbers = #tpu.dot_dimension_numbers<[1], [0], [0], [1], [0, 0, 1, 1], [], []>} : vector<2x32xf32>, vector<32x384xf32>, vector<2x384xf32> -> vector<2x384xf32>
    %16 = arith.mulf %7, %15 : vector<2x384xf32>
    %c0_11 = arith.constant 0 : index
    %c0_12 = arith.constant 0 : index
    %17 = vector.load %arg2[%c0_11, %c0_12] : memref<1x384xf32, #tpu.memory_space<vmem>>, vector<1x384xf32>
    %18 = vector.broadcast %17 : vector<1x384xf32> to vector<2x384xf32>
    %19 = arith.mulf %16, %18 : vector<2x384xf32>
    %c0_13 = arith.constant 0 : index
    %c0_14 = arith.constant 0 : index
    %20 = vector.load %arg3[%c0_13, %c0_14] : memref<1x384xf32, #tpu.memory_space<vmem>>, vector<1x384xf32>
    %21 = vector.broadcast %20 : vector<1x384xf32> to vector<2x384xf32>
    %22 = arith.addf %19, %21 : vector<2x384xf32>
    %c0_15 = arith.constant 0 : index
    %c0_16 = arith.constant 0 : index
    %23 = vector.load %arg6[%c0_15, %c0_16] : memref<2x384xf32, #tpu.memory_space<vmem>>, vector<2x384xf32>
    tpu.vector_store %arg6[%c0_15, %c0_16], %22 {strides = array<i32>} : memref<2x384xf32, #tpu.memory_space<vmem>>, vector<2x384xf32>,
    %c0_17 = arith.constant 0 : index
    %c0_18 = arith.constant 0 : index
    %24 = vector.load %arg7[%c0_17, %c0_18] : memref<2x32xf32, #tpu.memory_space<vmem>>, vector<2x32xf32>
    tpu.vector_store %arg7[%c0_17, %c0_18], %5 {strides = array<i32>} : memref<2x32xf32, #tpu.memory_space<vmem>>, vector<2x32xf32>,
    %c0_19 = arith.constant 0 : index
    %c0_20 = arith.constant 0 : index
    %25 = vector.load %arg8[%c0_19, %c0_20] : memref<2x32xf32, #tpu.memory_space<vmem>>, vector<2x32xf32>
    tpu.vector_store %arg8[%c0_19, %c0_20], %14 {strides = array<i32>} : memref<2x32xf32, #tpu.memory_space<vmem>>, vector<2x32xf32>,
    return
  }
  func.func @transform_0(%arg0: i32) -> (i32, i32) {
    %c0_i32 = arith.constant 0 : i32
    %c0_i32_0 = arith.constant 0 : i32
    return %arg0, %c0_i32 : i32, i32
  }
  func.func @transform_1(%arg0: i32) -> (i32, i32) {
    %c0_i32 = arith.constant 0 : i32
    %c0_i32_0 = arith.constant 0 : i32
    %c0_i32_1 = arith.constant 0 : i32
    return %c0_i32, %c0_i32_0 : i32, i32
  }
  func.func @transform_2(%arg0: i32) -> (i32, i32) {
    %c0_i32 = arith.constant 0 : i32
    %c0_i32_0 = arith.constant 0 : i32
    %c0_i32_1 = arith.constant 0 : i32
    return %c0_i32, %c0_i32_0 : i32, i32
  }
  func.func @transform_3(%arg0: i32) -> (i32, i32) {
    %c0_i32 = arith.constant 0 : i32
    %c0_i32_0 = arith.constant 0 : i32
    %c0_i32_1 = arith.constant 0 : i32
    return %c0_i32, %c0_i32_0 : i32, i32
  }
  func.func @transform_4(%arg0: i32) -> (i32, i32) {
    %c0_i32 = arith.constant 0 : i32
    %c0_i32_0 = arith.constant 0 : i32
    %c0_i32_1 = arith.constant 0 : i32
    return %c0_i32, %c0_i32_0 : i32, i32
  }
  func.func @transform_5(%arg0: i32) -> (i32, i32) {
    %c0_i32 = arith.constant 0 : i32
    %c0_i32_0 = arith.constant 0 : i32
    return %arg0, %c0_i32 : i32, i32
  }
  func.func @transform_6(%arg0: i32) -> (i32, i32) {
    %c0_i32 = arith.constant 0 : i32
    %c0_i32_0 = arith.constant 0 : i32
    return %arg0, %c0_i32 : i32, i32
  }
  func.func @transform_7(%arg0: i32) -> (i32, i32) {
    %c0_i32 = arith.constant 0 : i32
    %c0_i32_0 = arith.constant 0 : i32
    return %arg0, %c0_i32 : i32, i32
  }
}

</mosaic_0001>

<bundles_post_ra>
// kernel: tpu_custom_call.1
= control target key start
LH: loop header
LB: loop body
LE: loop exit
PB: predicated region body
PF: predicated region fallthrough
CT: control target
= control target key end

     0   :  { %13 = vsyncpa [#allocation3], 0  ;;  %v1134_v3 = vmov 0.0   ;;  %v1135_v20 = vmov 1983009808   ;;  %v91_v22 = vlaneseq  ;;  %s1705_s0 = inlined_call_operand.vmem [shape: f32[2,384], index: 0, kind: input, shape index: {}]   ;;  %s1706_s1 = inlined_call_operand.vmem [shape: f32[1,384], index: 1, kind: input, shape index: {}]   ;;  %s1707_s2 = inlined_call_operand.vmem [shape: f32[1,384], index: 2, kind: input, shape index: {}]   ;;  %s1708_s3 = inlined_call_operand.vmem [shape: f32[384,32], index: 3, kind: input, shape index: {}]   ;;  %s1709_s4 = inlined_call_operand.vmem [shape: f32[32,384], index: 4, kind: input, shape index: {}]   ;;  %s1710_s5 = inlined_call_operand.hbm [shape: f32[2,384], index: 5, kind: output, shape index: {0}]   ;;  %s1711_s6 = inlined_call_operand.hbm [shape: f32[2,32], index: 6, kind: output, shape index: {1}]   ;;  %s1712_s7 = inlined_call_operand.hbm [shape: f32[2,32], index: 7, kind: output, shape index: {2}]  }
   0x1   :  { %v1183_v0 = vld [vmem:[%s1708_s3 + $0xf8] sm:$0xff]  ;;  %v1193_v2 = vld [vmem:[%s1708_s3 + $0xf0] sm:$0xff]  ;;  %969 = vmatprep.subr.mxu1 %v1134_v3  ;;  %v1212_v6 = vld [vmem:[%s1708_s3 + $0xe8] sm:$0xff]  ;;  %v89_v21 = vunpack.c.l.s4 %v1135_v20 }
   0x2   :  { %v1188_v1 = vld [vmem:[%s1708_s3 + $0x78] sm:$0xff]  ;;  %855 = vmatprep.subr.mxu0 %v1183_v0  ;;  %v1200_v4 = vld [vmem:[%s1708_s3 + $0x70] sm:$0xff]  ;;  %v1224_v8 = vld [vmem:[%s1708_s3 + $0x68] sm:$0xff]  ;;  %v1333_v30 = vshrl.u32 %v91_v22, 7 }
   0x3   :  { %v1205_v5 = vld [vmem:[%s1708_s3 + $0x178] sm:$0xff]  ;;  %856 = vmatpush3.msra.mxu0 %v1188_v1  ;;  %v1217_v7 = vld [vmem:[%s1708_s3 + $0x170] sm:$0xff]  ;;  %v1229_v9 = vld [vmem:[%s1708_s3 + $0x168] sm:$0xff]  ;;  %v90_v29 = vunpack.c.0.s8 %v89_v21 }
   0x4   :  { %970 = vmatpush3.msra.mxu1 %v1205_v5  ;;  %857 = vmatprep.subr.mxu0 %v1193_v2  ;;  %v1236_v10 = vld [vmem:[%s1708_s3 + $0xe0] sm:$0xff]  ;;  %v1255_v13 = vld [vmem:[%s1708_s3 + $0xd8] sm:$0xff]  ;;  %v1274_v16 = vld [vmem:[%s1708_s3 + $0xd0] sm:$0xff]  ;;  %1721 = vst [vmem:[#allocation9_spill] sm:$0xff] %v1333_v30 }
   0x5   :  { %971 = vmatprep.subr.mxu1 %v1134_v3  ;;  %858 = vmatpush3.msra.mxu0 %v1200_v4  ;;  %v1243_v11 = vld [vmem:[%s1708_s3 + $0x60] sm:$0xff]  ;;  %v1262_v14 = vld [vmem:[%s1708_s3 + $0x58] sm:$0xff]  ;;  %v1281_v17 = vld [vmem:[%s1708_s3 + $0x50] sm:$0xff] }
   0x6   :  { %972 = vmatpush3.msra.mxu1 %v1217_v7  ;;  %859 = vmatprep.subr.mxu0 %v1212_v6  ;;  %v1248_v12 = vld [vmem:[%s1708_s3 + $0x160] sm:$0xff]  ;;  %v1267_v15 = vld [vmem:[%s1708_s3 + $0x158] sm:$0xff]  ;;  %v1286_v18 = vld [vmem:[%s1708_s3 + $0x150] sm:$0xff] }
   0x7   :  { %973 = vmatprep.subr.mxu1 %v1134_v3  ;;  %860 = vmatpush3.msra.mxu0 %v1224_v8  ;;  %v1293_v19 = vld [vmem:[%s1708_s3 + $0xc8] sm:$0xff]  ;;  %v1312_v25 = vld [vmem:[%s1708_s3 + $0xc0] sm:$0xff]  ;;  %v1331_v28 = vld [vmem:[%s1708_s3 + $0xb8] sm:$0xff] }
   0x8   :  { %974 = vmatpush3.msra.mxu1 %v1229_v9  ;;  %861 = vmatprep.subr.mxu0 %v1236_v10  ;;  %v1300_v23 = vld [vmem:[%s1708_s3 + $0x48] sm:$0xff]  ;;  %v1319_v26 = vld [vmem:[%s1708_s3 + $0x40] sm:$0xff]  ;;  %v1340_v31 = vld [vmem:[%s1708_s3 + $0x38] sm:$0xff] }
   0x9   :  { %975 = vmatprep.subr.mxu1 %v1134_v3  ;;  %862 = vmatpush3.msra.mxu0 %v1243_v11  ;;  %v1305_v24 = vld [vmem:[%s1708_s3 + $0x148] sm:$0xff]  ;;  %v1324_v27 = vld [vmem:[%s1708_s3 + $0x140] sm:$0xff]  ;;  %v1345_v32 = vld [vmem:[%s1708_s3 + $0x138] sm:$0xff] }
   0xa   :  { %976 = vmatpush3.msra.mxu1 %v1248_v12  ;;  %863 = vmatprep.subr.mxu0 %v1255_v13  ;;  %v1352_v33 = vld [vmem:[%s1708_s3 + $0xb0] sm:$0xff] }
   0xb   :  { %977 = vmatprep.subr.mxu1 %v1134_v3  ;;  %864 = vmatpush3.msra.mxu0 %v1262_v14 }
   0xc   :  { %978 = vmatpush3.msra.mxu1 %v1267_v15  ;;  %865 = vmatprep.subr.mxu0 %v1274_v16 }
   0xd   :  { %979 = vmatprep.subr.mxu1 %v1134_v3  ;;  %866 = vmatpush3.msra.mxu0 %v1281_v17 }
   0xe   :  { %980 = vmatpush3.msra.mxu1 %v1286_v18  ;;  %867 = vmatprep.subr.mxu0 %v1293_v19 }
   0xf   :  { %981 = vmatprep.subr.mxu1 %v1134_v3  ;;  %868 = vmatpush3.msra.mxu0 %v1300_v23 }
  0x10   :  { %982 = vmatpush3.msra.mxu1 %v1305_v24  ;;  %869 = vmatprep.subr.mxu0 %v1312_v25 }
  0x11   :  { %983 = vmatprep.subr.mxu1 %v1134_v3  ;;  %870 = vmatpush3.msra.mxu0 %v1319_v26 }
  0x12   :  { %984 = vmatpush3.msra.mxu1 %v1324_v27 }
  0x13   :  { %14 = vsyncpa [#allocation5], 0  ;;  %871 = vmatprep.subr.mxu0 %v1331_v28  ;;  %985 = vmatprep.subr.mxu1 %v1134_v3  ;;  %v1359_v34 = vld [vmem:[%s1708_s3 + $0x30] sm:$0xff]  ;;  %v1371_v36 = vld [vmem:[%s1708_s3 + $0xa8] sm:$0xff]  ;;  %v1374_v37 = vsub.s32 %v90_v29, %v1333_v30  ;;  %vm1136_vm0 = vmmov 0   ;;  %vm247_vm1 = vcmask 261120  }
  0x14   :  { %v1364_v35 = vld [vmem:[%s1708_s3 + $0x130] sm:$0xff]  ;;  %872 = vmatpush3.msra.mxu0 %v1340_v31  ;;  %986 = vmatpush3.msra.mxu1 %v1345_v32  ;;  %v1381_v38 = vld [vmem:[%s1708_s3 + $0x28] sm:$0xff]  ;;  %v1391_v40 = vld [vmem:[%s1705_s0] sm:$0x3f]  ;;  %vm807_vm2 = vcmask 254976  }
  0x15   :  { %873 = vmatprep.subr.mxu0 %v1352_v33  ;;  %987 = vmatprep.subr.mxu1 %v1134_v3  ;;  %v1386_v39 = vld [vmem:[%s1708_s3 + $0x128] sm:$0xff]  ;;  %v1398_v41 = vld [vmem:[%s1708_s3 + $0xa0] sm:$0xff]  ;;  %v1417_v44 = vld [vmem:[%s1708_s3 + $0x98] sm:$0xff]  ;;  %v94_v45 = vrot.slane %v1391_v40, %v1374_v37  ;;  %v87_v54 = vcombine.high %v1391_v40, %v1391_v40 }
  0x16   :  { %874 = vmatpush3.msra.mxu0 %v1359_v34  ;;  %988 = vmatpush3.msra.mxu1 %v1364_v35  ;;  %v1405_v42 = vld [vmem:[%s1708_s3 + $0x20] sm:$0xff]  ;;  %v1426_v46 = vld [vmem:[%s1708_s3 + $0x18] sm:$0xff]  ;;  %v1438_v48 = vld [vmem:[%s1708_s3 + $0x90] sm:$0xff] }
  0x17   :  { %875 = vmatprep.subr.mxu0 %v1371_v36  ;;  %989 = vmatprep.subr.mxu1 %v1134_v3  ;;  %v1410_v43 = vld [vmem:[%s1708_s3 + $0x120] sm:$0xff]  ;;  %v1431_v47 = vld [vmem:[%s1708_s3 + $0x118] sm:$0xff]  ;;  %v1445_v49 = vld [vmem:[%s1708_s3 + $0x10] sm:$0xff]  ;;  %v102_v52 = vcombine.high %v94_v45, %v94_v45  ;;  %v101_v59 = vrot.slane %v87_v54, %v1374_v37 }
  0x18   :  { %876 = vmatpush3.msra.mxu0 %v1381_v38  ;;  %990 = vmatpush3.msra.mxu1 %v1386_v39  ;;  %v1450_v50 = vld [vmem:[%s1708_s3 + $0x110] sm:$0xff]  ;;  %v1457_v51 = vld [vmem:[%s1708_s3 + $0x88] sm:$0xff]  ;;  %v1473_v55 = vld [vmem:[%s1708_s3 + $0x80] sm:$0xff] }
  0x19   :  { %877 = vmatprep.subr.mxu0 %v1398_v41  ;;  %991 = vmatprep.subr.mxu1 %v1134_v3  ;;  %v1464_v53 = vld [vmem:[%s1708_s3 + $0x8] sm:$0xff]  ;;  %v1485_v57 = vld [vmem:[%s1708_s3] sm:$0xff]  ;;  %v1508_v60 = vld [vmem:[%s1709_s4 + $0x50] sm:$0xff] }
  0x1a   :  { %878 = vmatpush3.msra.mxu0 %v1405_v42  ;;  %992 = vmatpush3.msra.mxu1 %v1410_v43  ;;  %v1478_v56 = vld [vmem:[%s1708_s3 + $0x108] sm:$0xff]  ;;  %v1491_v58 = vld [vmem:[%s1708_s3 + $0x100] sm:$0xff]  ;;  %v1519_v62 = vld [vmem:[%s1709_s4 + $0x58] sm:$0xff] }
  0x1b   :  { %879 = vmatprep.subr.mxu0 %v1417_v44  ;;  %993 = vmatprep.subr.mxu1 %v1134_v3  ;;  %v1514_v61 = vld [vmem:[%s1709_s4 + $0x48] sm:$0xff]  ;;  %v1526_v63 = vld [vmem:[%s1709_s4 + $0x38] sm:$0xff]  ;;  %v1533_v20 = vld [vmem:[%s1709_s4 + $0x30] sm:$0xff] }
  0x1c   :  { %880 = vmatpush3.msra.mxu0 %v1426_v46  ;;  %994 = vmatpush3.msra.mxu1 %v1431_v47  ;;  %1722 = vst [vmem:[#allocation10_spill] sm:$0xff] %v1533_v20  ;;  %v1538_v21 = vld [vmem:[%s1709_s4 + $0x40] sm:$0xff]  ;;  %v1552_v29 = vld [vmem:[%s1709_s4 + $0x18] sm:$0xff] }
  0x1d   :  { %881 = vmatprep.subr.mxu0 %v1438_v48  ;;  %995 = vmatprep.subr.mxu1 %v1134_v3  ;;  %1723 = vst [vmem:[#allocation11_spill] sm:$0xff] %v1538_v21  ;;  %v1545_v22 = vld [vmem:[%s1709_s4 + $0x20] sm:$0xff]  ;;  %1725 = vst [vmem:[#allocation13_spill] sm:$0xff] %v1552_v29 }
  0x1e   :  { %882 = vmatpush3.msra.mxu0 %v1445_v49  ;;  %996 = vmatpush3.msra.mxu1 %v1450_v50  ;;  %1724 = vst [vmem:[#allocation12_spill] sm:$0xff] %v1545_v22  ;;  %v1571_v54 = vld [vmem:[%s1709_s4] sm:$0xff] }
  0x1f   :  { %883 = vmatprep.subr.mxu0 %v1457_v51  ;;  %997 = vmatprep.subr.mxu1 %v1134_v3 }
  0x20   :  { %884 = vmatpush3.msra.mxu0 %v1464_v53  ;;  %170 = vmatprep.mubr.f32.mxu0 %v102_v52  ;;  %v1564_v52 = vld [vmem:[%s1709_s4 + $0x8] sm:$0xff] }
  0x21   :  { %885 = vmatprep.subr.mxu0 %v1473_v55  ;;  %998 = vmatpush3.msra.mxu1 %v1478_v56  ;;  %1727 = vst [vmem:[#allocation15_spill] sm:$0xff] %v1564_v52 }
  0x22   :  { %886 = vmatpush3.msra.mxu0 %v1485_v57  ;;  %999 = vmatprep.subr.mxu1 %v1134_v3 }
  0x23   :  { %171 = vmatmul.mubr.f32.vlgmr.msra.gmra.mxu0 %v94_v45  ;;  %1000 = vmatpush3.msra.mxu1 %v1491_v58  ;;  %v1557_v45 = vld [vmem:[%s1709_s4 + $0x28] sm:$0xff] }
  0x24   :  { %1001 = vmatprep.mubr.msk.f32.mxu1 %vm1136_vm0, %v1134_v3  ;;  %1004 = vmatprep.subr.mxu1 %v1134_v3  ;;  %1726 = vst [vmem:[#allocation14_spill] sm:$0xff] %v1557_v45 }
  0x25   :  { %1002 = vmatmul.mubr.f32.vlgmr.msra.gmra.mxu1 %v101_v59  ;;  %315 = vmatprep.mubr.f32.mxu0 %v1134_v3  ;;  %v1576_v59 = vld [vmem:[%s1709_s4 + $0x10] sm:$0xff]  ;;  %s1137_s4 = smov [#allocation4]  }
  0x26   :  { %1012 = vmatprep.mubr.msk.f32.mxu1 %vm1136_vm0, %v1134_v3  ;;  %275 = vmatprep.subr.mxu0 %v1508_v60  ;;  %s826_s27 = sshll.u32 %s1137_s4, 4  ;;  %s827_s27 = int_to_ptr.vmem [resolvable:$true] %s826_s27 }
  0x27   :  { %276 = vmatpush1.msra.mxu0 %v1514_v61  ;;  %1005 = vmatpush3.msra.mxu1 %v1519_v62  ;;  %s1070_s3 = scalar_lea.vmem %s827_s27, 32  ;;  %p1075_p1 = scmp.lt.s32.totalorder %s827_s27, %s827_s27 }
  0x28   :  { %277 = vmatprep.subr.mxu0 %v1526_v63  ;;  %1006 = vmatprep.subr.mxu1 %v1134_v3  ;;  %p1071_p0 = scmp.ne.s32.totalorder %s827_s27, %s1070_s3  ;;  %p1076_p2 = scmp.lt.s32.totalorder %s1070_s3, %s1070_s3 }
  0x29   :  { %278 = vmatpush1.msra.mxu0 %v1533_v20  ;;  %1007 = vmatpush3.msra.mxu1 %v1538_v21 }
  0x2a   :  { %279 = vmatprep.subr.mxu0 %v1545_v22  ;;  %1008 = vmatprep.subr.mxu1 %v1134_v3  ;;  %p1077_p3 = por %p1076_p2, %p1075_p1 }
  0x2b   :  { %280 = vmatpush1.msra.mxu0 %v1552_v29  ;;  %1009 = vmatpush3.msra.mxu1 %v1557_v45 }
  0x2c   :  { %281 = vmatprep.subr.mxu0 %v1564_v52  ;;  %1010 = vmatprep.subr.mxu1 %v1134_v3  ;;  %p1078_p4 = pnand %p1077_p3, %p1071_p0 }
  0x2d   :  { %282 = vmatpush1.msra.mxu0 %v1571_v54  ;;  %1011 = vmatpush3.msra.mxu1 %v1576_v59 }
  0x2e   :  { %1015 = vmatprep.subr.mxu1 %v1134_v3  ;;  %912 = vmatprep.subr.mxu0 %v1183_v0 }
  0xe3   :  { %v887_v30 = vpop.f32.mrf.mxu0 }
  0xe5   :  { %v888_v52 = vpop.f32.mrf.mxu0  ;;  %v242_v29 = vpop.f32.mrf.mxu1 }
  0xe6   :  { %v889_v45 = vadd.f32 %v888_v52, %v887_v30 }
  0xe7   :  { %v1003_v22 = vpop.f32.mrf.mxu1 }
  0xe8   :  { %v243_v20 = vadd.f32 %v889_v45, %v242_v29 }
  0xea   :  { %v246_v21 = vmul.f32 0.083333336, %v243_v20 }
  0xec   :  { %851 = vmatmul.mubr.msk.f32.vlgmr.msra.gmra.mxu0 %vm247_vm1, %v246_v21  ;;  %1013 = vmatmul.mubr.msk.f32.vlgmr.msra.gmra.mxu1 %vm247_vm1, %v246_v21  ;;  %808 = vst.msk [vmem:[#allocation4] sm:$0x3] %vm807_vm2, %v246_v21 }
  0xed   :  { %1016 = vmatpush3.msra.mxu1 %v1205_v5  ;;  %913 = vmatpush3.msra.mxu0 %v1188_v1 }
  0xee   :  { %1017 = vmatprep.subr.mxu1 %v1134_v3  ;;  %914 = vmatprep.subr.mxu0 %v1193_v2 }
  0xef   :  { %1018 = vmatpush3.msra.mxu1 %v1217_v7  ;;  %915 = vmatpush3.msra.mxu0 %v1200_v4 }
  0xf0   :  { %1019 = vmatprep.subr.mxu1 %v1134_v3  ;;  %916 = vmatprep.subr.mxu0 %v1212_v6 }
  0xf1   :  { %1020 = vmatpush3.msra.mxu1 %v1229_v9  ;;  %917 = vmatpush3.msra.mxu0 %v1224_v8 }
  0xf2   :  { %1021 = vmatprep.subr.mxu1 %v1134_v3  ;;  %918 = vmatprep.subr.mxu0 %v1236_v10 }
  0xf3   :  { %1022 = vmatpush3.msra.mxu1 %v1248_v12  ;;  %919 = vmatpush3.msra.mxu0 %v1243_v11 }
  0xf4   :  { %1023 = vmatprep.subr.mxu1 %v1134_v3  ;;  %920 = vmatprep.subr.mxu0 %v1255_v13 }
  0xf5   :  { %1024 = vmatpush3.msra.mxu1 %v1267_v15  ;;  %921 = vmatpush3.msra.mxu0 %v1262_v14  ;;  %v1728_v15 = vld [vmem:[#allocation11_spill] sm:$0xff] }
  0xf6   :  { %1025 = vmatprep.subr.mxu1 %v1134_v3  ;;  %922 = vmatprep.subr.mxu0 %v1274_v16  ;;  %v1729_v16 = vld [vmem:[#allocation10_spill] sm:$0xff] }
  0xf7   :  { %1026 = vmatpush3.msra.mxu1 %v1286_v18  ;;  %923 = vmatpush3.msra.mxu0 %v1281_v17  ;;  %v1730_v17 = vld [vmem:[#allocation12_spill] sm:$0xff]  ;;  %v1731_v18 = vld [vmem:[#allocation14_spill] sm:$0xff] }
  0xf8   :  { %1027 = vmatprep.subr.mxu1 %v1134_v3  ;;  %924 = vmatprep.subr.mxu0 %v1293_v19  ;;  %v1732_v19 = vld [vmem:[#allocation13_spill] sm:$0xff] }
  0xf9   :  { %1028 = vmatpush3.msra.mxu1 %v1305_v24  ;;  %925 = vmatpush3.msra.mxu0 %v1300_v23  ;;  %v1733_v23 = vld [vmem:[#allocation15_spill] sm:$0xff] }
  0xfa   :  { %1029 = vmatprep.subr.mxu1 %v1134_v3  ;;  %926 = vmatprep.subr.mxu0 %v1312_v25 }
  0xfb   :  { %1030 = vmatpush3.msra.mxu1 %v1324_v27  ;;  %927 = vmatpush3.msra.mxu0 %v1319_v26 }
  0xfc   :  { %1031 = vmatprep.subr.mxu1 %v1134_v3  ;;  %928 = vmatprep.subr.mxu0 %v1331_v28 }
  0xfd   :  { %1032 = vmatpush3.msra.mxu1 %v1345_v32  ;;  %929 = vmatpush3.msra.mxu0 %v1340_v31 }
  0xfe   :  { %1033 = vmatprep.subr.mxu1 %v1134_v3  ;;  %930 = vmatprep.subr.mxu0 %v1352_v33 }
  0xff   :  { %1034 = vmatpush3.msra.mxu1 %v1364_v35  ;;  %931 = vmatpush3.msra.mxu0 %v1359_v34 }
 0x100   :  { %1035 = vmatprep.subr.mxu1 %v1134_v3  ;;  %932 = vmatprep.subr.mxu0 %v1371_v36 }
 0x101   :  { %1036 = vmatpush3.msra.mxu1 %v1386_v39  ;;  %933 = vmatpush3.msra.mxu0 %v1381_v38 }
 0x102   :  { %1037 = vmatprep.subr.mxu1 %v1134_v3  ;;  %934 = vmatprep.subr.mxu0 %v1398_v41 }
 0x103   :  { %1038 = vmatpush3.msra.mxu1 %v1410_v43  ;;  %935 = vmatpush3.msra.mxu0 %v1405_v42 }
 0x104   :  { %1039 = vmatprep.subr.mxu1 %v1134_v3  ;;  %936 = vmatprep.subr.mxu0 %v1417_v44 }
 0x105   :  { %1040 = vmatpush3.msra.mxu1 %v1431_v47  ;;  %937 = vmatpush3.msra.mxu0 %v1426_v46 }
 0x106   :  { %1041 = vmatprep.subr.mxu1 %v1134_v3  ;;  %938 = vmatprep.subr.mxu0 %v1438_v48 }
 0x107   :  { %1042 = vmatpush3.msra.mxu1 %v1450_v50  ;;  %939 = vmatpush3.msra.mxu0 %v1445_v49 }
 0x108   :  { %1043 = vmatprep.subr.mxu1 %v1134_v3  ;;  %940 = vmatprep.subr.mxu0 %v1457_v51 }
 0x109   :  { %1044 = vmatpush3.msra.mxu1 %v1478_v56  ;;  %941 = vmatpush3.msra.mxu0 %v1464_v53 }
 0x10a   :  { %1045 = vmatprep.subr.mxu1 %v1134_v3  ;;  %942 = vmatprep.subr.mxu0 %v1473_v55 }
 0x10b   :  { %1046 = vmatpush3.msra.mxu1 %v1491_v58  ;;  %1047 = vmatprep.mubr.msk.f32.mxu1 %vm1136_vm0, %v1134_v3 }
 0x10c   :  { %943 = vmatpush3.msra.mxu0 %v1485_v57  ;;  %1050 = vmatprep.subr.mxu1 %v1134_v3 }
 0x10d   :  { %604 = vmatprep.subr.mxu0 %v1508_v60 }
 0x1ac   :  { %v317_v0 = vpop.f32.mrf.mxu0  ;;  %v388_v1 = vpop.f32.mrf.mxu1 }
 0x1ad   :  { %v409_v6 = vrot.slane %v388_v1, %v1374_v37 }
 0x1ae   :  { %v319_v2 = vpop.f32.mrf.mxu0  ;;  %v1014_v4 = vpop.f32.mrf.mxu1 }
 0x1af   :  { %v395_v5 = vcombine.low %v317_v0, %v319_v2 }
 0x1b1   :  { %v402_v7 = vrot.slane %v395_v5, %v1374_v37 }
 0x1b3   :  { %v410_v8 = vcombine.low %v402_v7, %v409_v6 }
 0x1b5   :  { %v1654_v9 = vsub.f32 %v1391_v40, %v410_v8 }
 0x1b7   :  { %v413_v10 = vmul.f32 %v1654_v9, %v1654_v9 }
 0x1b9   :  { %v422_v11 = vrot.slane %v413_v10, %v1374_v37  ;;  %v415_v12 = vcombine.high %v413_v10, %v413_v10 }
 0x1bb   :  { %v430_v13 = vcombine.high %v422_v11, %v422_v11  ;;  %v429_v14 = vrot.slane %v415_v12, %v1374_v37 }
 0x1bd   :  { %498 = vmatprep.mubr.f32.mxu0 %v430_v13  ;;  %1048 = vmatmul.mubr.f32.vlgmr.msra.gmra.mxu1 %v429_v14 }
 0x1be   :  { %499 = vmatmul.mubr.f32.vlgmr.msra.gmra.mxu0 %v422_v11  ;;  %1051 = vmatpush3.msra.mxu1 %v1519_v62 }
 0x1bf   :  { %605 = vmatpush1.msra.mxu0 %v1514_v61  ;;  %1052 = vmatprep.subr.mxu1 %v1134_v3 }
 0x1c0   :  { %606 = vmatprep.subr.mxu0 %v1526_v63  ;;  %1053 = vmatpush3.msra.mxu1 %v1728_v15 }
 0x1c1   :  { %607 = vmatpush1.msra.mxu0 %v1729_v16  ;;  %1054 = vmatprep.subr.mxu1 %v1134_v3 }
 0x1c2   :  { %608 = vmatprep.subr.mxu0 %v1730_v17  ;;  %1055 = vmatpush3.msra.mxu1 %v1731_v18 }
 0x1c3   :  { %609 = vmatpush1.msra.mxu0 %v1732_v19  ;;  %1056 = vmatprep.subr.mxu1 %v1134_v3 }
 0x1c4   :  { %610 = vmatprep.subr.mxu0 %v1733_v23  ;;  %644 = vmatprep.mubr.f32.mxu0 %v1134_v3 }
 0x1c5   :  { %611 = vmatpush1.msra.mxu0 %v1571_v54  ;;  %1057 = vmatpush3.msra.mxu1 %v1576_v59 }
 0x1c6   :  { %1058 = vmatprep.mubr.msk.f32.mxu1 %vm1136_vm0, %v1134_v3 }
 0x27d   :  { %v570_v24 = vpop.f32.mrf.mxu1 }
 0x27e   :  { %v944_v25 = vpop.f32.mrf.mxu0 }
 0x27f   :  { %v1049_v26 = vpop.f32.mrf.mxu1 }
 0x280   :  { %v945_v27 = vpop.f32.mrf.mxu0 }
 0x281   :  { %v946_v28 = vadd.f32 %v945_v27, %v944_v25 }
 0x283   :  { %v571_v30 = vadd.f32 %v946_v28, %v570_v24 }
 0x285   :  { %v574_v31 = vmul.f32 0.083333336, %v571_v30 }
 0x287   :  { %v575_v32 = vadd.f32 0.5, %v574_v31 }
 0x289   :  { %1068 = vrsqrt.f32 %v575_v32 }
 0x296   :  { %v1069_v33 = vpop.eup %1068 }
 0x297   :  { %853 = vmatmul.mubr.msk.f32.vlgmr.msra.gmra.mxu0 %vm247_vm1, %v1069_v33  ;;  %1059 = vmatmul.mubr.msk.f32.vlgmr.msra.gmra.mxu1 %vm247_vm1, %v1069_v33  ;;  %809 = vst.msk [vmem:[#allocation6] sm:$0x3] %vm807_vm2, %v1069_v33 }
 0x298   :  { %1081 = shalt.err (!%p1078_p4)
}
 0x299   :  { %829 = dma.vmem_to_hbm [thread:$0]  %s827_s27, 32, %s1711_s6, [#allocation5]  }
 0x29a   :  { %s1138_s30 = smov [#allocation6]  }
 0x29b   :  { %s836_s8 = sshll.u32 %s1138_s30, 4  ;;  %s837_s8 = int_to_ptr.vmem [resolvable:$true] %s836_s8 }
 0x29c   :  { %s1090_s9 = scalar_lea.vmem %s837_s8, 32  ;;  %p1095_p6 = scmp.lt.s32.totalorder %s837_s8, %s837_s8 }
 0x29d   :  { %p1091_p5 = scmp.ne.s32.totalorder %s837_s8, %s1090_s9  ;;  %p1096_p7 = scmp.lt.s32.totalorder %s1090_s9, %s1090_s9 }
 0x29f   :  { %p1097_p8 = por %p1096_p7, %p1095_p6 }
 0x2a1   :  { %p1098_p9 = pnand %p1097_p8, %p1091_p5 }
 0x2a3   :  { %1101 = shalt.err (!%p1098_p9)
}
 0x2a4   :  { %839 = dma.vmem_to_hbm [thread:$0]  %s837_s8, 32, %s1712_s7, [#allocation5]   ;;  %v1734_v3 = vld [vmem:[#allocation9_spill] sm:$0xff]  ;;  %v742_v36 = vld [vmem:[%s1706_s1] sm:$0x7] }
 0x2a5   :  { %v746_v34 = vsub.s32 0, %v1734_v3  ;;  %v750_v35 = vsub.s32 1, %v1734_v3  ;;  %v774_v38 = vld [vmem:[%s1707_s2] sm:$0x7]  ;;  %v754_v41 = vsub.s32 2, %v1734_v3  ;;  %s1139_s1 = smov [#allocation2]  }
 0x2a6   :  { %s816_s2 = sshll.u32 %s1139_s1, 4  ;;  %s817_s2 = int_to_ptr.vmem [resolvable:$true] %s816_s2 }
 0x2a7   :  { %v747_v39 = vrot.slane %v742_v36, %v746_v34  ;;  %v751_v40 = vrot.slane %v742_v36, %v750_v35  ;;  %v779_v42 = vrot.slane %v774_v38, %v746_v34  ;;  %v783_v43 = vrot.slane %v774_v38, %v750_v35  ;;  %s1110_s7 = scalar_lea.vmem %s817_s2, 96  ;;  %p1115_p11 = scmp.lt.s32.totalorder %s817_s2, %s817_s2 }
 0x2a8   :  { %v755_v44 = vrot.slane %v742_v36, %v754_v41  ;;  %v787_v49 = vrot.slane %v774_v38, %v754_v41  ;;  %p1111_p10 = scmp.ne.s32.totalorder %s817_s2, %s1110_s7  ;;  %p1116_p12 = scmp.lt.s32.totalorder %s1110_s7, %s1110_s7 }
 0x2a9   :  { %v756_v46 = vcombine.low %v747_v39, %v751_v40  ;;  %v788_v50 = vcombine.low %v779_v42, %v783_v43 }
 0x2aa   :  { %v770_v57 = vrot.slane %v755_v44, %v1374_v37  ;;  %v802_v62 = vrot.slane %v787_v49, %v1374_v37  ;;  %p1117_p13 = por %p1116_p12, %p1115_p11 }
 0x2ab   :  { %v763_v56 = vrot.slane %v756_v46, %v1374_v37  ;;  %v795_v61 = vrot.slane %v788_v50, %v1374_v37 }
 0x2ac   :  { %p1118_p0 = pnand %p1117_p13, %p1111_p10 }
 0x2ad   :  { %v771_v20 = vcombine.low %v763_v56, %v770_v57  ;;  %v803_v22 = vcombine.low %v795_v61, %v802_v62 }
 0x357   :  { %v646_v47 = vpop.f32.mrf.mxu0  ;;  %v717_v48 = vpop.f32.mrf.mxu1 }
 0x358   :  { %v738_v58 = vrot.slane %v717_v48, %v1374_v37 }
 0x359   :  { %v648_v51 = vpop.f32.mrf.mxu0  ;;  %v1060_v53 = vpop.f32.mrf.mxu1 }
 0x35a   :  { %v724_v55 = vcombine.low %v646_v47, %v648_v51 }
 0x35c   :  { %v731_v60 = vrot.slane %v724_v55, %v1374_v37 }
 0x35e   :  { %v739_v63 = vcombine.low %v731_v60, %v738_v58 }
 0x360   :  { %v741_v21 = vmul.f32 %v739_v63, %v1654_v9 }
 0x362   :  { %v773_v29 = vmul.f32 %v771_v20, %v741_v21 }
 0x364   :  { %v805_v45 = vadd.f32 %v803_v22, %v773_v29 }
 0x366   :  { %806 = vst [vmem:[#allocation2] sm:$0x3f] %v805_v45 }
 0x367   :  { %1121 = shalt.err (!%p1118_p0)
}
 0x368   :  { %819 = dma.vmem_to_hbm [thread:$0]  %s817_s2, 96, %s1710_s5, [#allocation3]  }
 0x369   :  { %1130 = dma.done.wait [#allocation3], 96  }
 0x36a   :  { %1131 = vsyncadd [#allocation3], 4294967200 }
 0x36b   :  { %1132 = dma.done.wait [#allocation5], 64  }
 0x36c   :  { %1133 = vsyncadd [#allocation5], 4294967232 }
 0x36d   :  { %849 = vsyncpa [#allocation3], 1 }
 0x36e   :  { %850 = vsyncpa [#allocation5], 1 }

</bundles_post_ra>
